<compile_context>
chip_gen: v5e
topology: v5e:2x2
jax: 0.10.0
libtpu: 0.0.40
codegen_flags: <defaults>
</compile_context>

<pallas_src>
import jax
import jax.numpy as jnp
from jax.experimental import pallas as pl
from jax.experimental.pallas import tpu as pltpu


_TM_TARGET = 256     # 256-aligned output tiles feed the v6e/v7x 256-wide MXU.
_TN_TARGET = 512
_TK_TARGET = 2048
_SUBLANE = 16        # bf16 packs (16, 128) per vreg.


def _linear_kernel(x_ref, w_ref, b_ref, o_ref, acc_ref):
    """One (tm, tn) output tile; K-reduction runs over grid axis 2."""
    k = pl.program_id(2)

    @pl.when(k == 0)
    def _init():
        acc_ref[...] = jnp.zeros_like(acc_ref)

    acc_ref[...] += jnp.dot(
        x_ref[...], w_ref[...], preferred_element_type=jnp.float32
    )

    @pl.when(k == pl.num_programs(2) - 1)
    def _finalize():
        # Bias added exactly once per output tile, in f32, cast at store.
        o_ref[...] = (acc_ref[...] + b_ref[...]).astype(o_ref.dtype)


def _round_up(n, m):
    return ((n + m - 1) // m) * m


def _choose_mn_tile(dim, target, align):
    """Pad dim up to the target tile (big dims) or a single aligned tile (small dims)."""
    if dim >= target:
        padded = _round_up(dim, target)
        return target, padded
    padded = _round_up(dim, align)
    return padded, padded


def _choose_k_tile(F):
    """Fold K into as few steps as possible without heavy zero-padding of K."""
    F_pad = _round_up(F, 128)
    if F_pad <= _TK_TARGET:
        return F_pad, F_pad          # whole reduction in one grid step
    for cand in (2048, 1536, 1024, 768, 512, 384, 256, 128):
        if F_pad % cand == 0:
            return cand, F_pad
    return 128, F_pad                # unreachable (128 always divides F_pad)


def prepare_linear_params(w, b, *, use_bf16_inputs=True):
    """One-time prep of the wrapped module's weights (outside the jitted forward).

    Casts W/b and pads them to tile-aligned shapes exactly once, so the hot
    forward path never re-reads/re-writes W in HBM just to change its dtype.
    """
    F, H = w.shape
    in_dtype = jnp.bfloat16 if use_bf16_inputs else w.dtype

    tn, H_pad = _choose_mn_tile(H, _TN_TARGET, 128)
    tk, F_pad = _choose_k_tile(F)

    wp = w.astype(in_dtype)
    bp = jnp.asarray(b, jnp.float32).reshape(1, H)
    if (F_pad, H_pad) != (F, H):
        wp = jnp.pad(wp, ((0, F_pad - F), (0, H_pad - H)))
    if H_pad != H:
        bp = jnp.pad(bp, ((0, 0), (0, H_pad - H)))

    return {
        "w": jax.device_put(wp),      # (F_pad, H_pad) in_dtype
        "b": jax.device_put(bp),      # (1, H_pad) f32
        "in_dtype": in_dtype,
        "F": F,
        "H": H,
        "tk": tk,
        "tn": tn,
    }


def pallas_linear(x, prepared):
    """y = x @ W + b via a tiled Pallas TPU matmul with f32 accumulation."""
    B, F = x.shape
    assert F == prepared["F"], (F, prepared["F"])
    H = prepared["H"]
    wp, bp = prepared["w"], prepared["b"]
    in_dtype = prepared["in_dtype"]
    tk, tn = prepared["tk"], prepared["tn"]
    F_pad, H_pad = wp.shape
    out_dtype = x.dtype

    tm, B_pad = _choose_mn_tile(B, _TM_TARGET, _SUBLANE)

    # v7x has 2 TensorCores: if the parallel (M, N) grid collapses to a single
    # tile for a non-trivial shape, split one axis so both cores get work.
    if (B_pad // tm) * (H_pad // tn) == 1:
        if B_pad >= 64 and H_pad >= 256 and (H_pad // 2) % 128 == 0:
            tn = H_pad // 2
        elif B_pad >= 128 and (B_pad // 2) % _SUBLANE == 0:
            tm = B_pad // 2

    # Activations are cast/padded per call (unavoidable: x is the live input).
    xp = x.astype(in_dtype)
    if (B_pad, F_pad) != (B, F):
        xp = jnp.pad(xp, ((0, B_pad - B), (0, F_pad - F)))

    grid = (B_pad // tm, H_pad // tn, F_pad // tk)
    g_m, g_n, _ = grid
    in_bytes = jnp.dtype(in_dtype).itemsize
    out_bytes = jnp.dtype(out_dtype).itemsize

    cost = pl.CostEstimate(
        flops=2 * B_pad * F_pad * H_pad,
        # Count tile re-reads: x is streamed once per N tile, W once per M tile.
        bytes_accessed=(
            g_n * B_pad * F_pad * in_bytes
            + g_m * F_pad * H_pad * in_bytes
            + g_m * H_pad * 4
            + B_pad * H_pad * out_bytes
        ),
        transcendentals=0,
    )

    out = pl.pallas_call(
        _linear_kernel,
        out_shape=jax.ShapeDtypeStruct((B_pad, H_pad), out_dtype),
        grid_spec=pltpu.PrefetchScalarGridSpec(
            num_scalar_prefetch=0,
            grid=grid,
            in_specs=[
                pl.BlockSpec((tm, tk), lambda i, j, k: (i, k)),
                pl.BlockSpec((tk, tn), lambda i, j, k: (k, j)),
                pl.BlockSpec((1, tn), lambda i, j, k: (0, j)),
            ],
            out_specs=pl.BlockSpec((tm, tn), lambda i, j, k: (i, j)),
            scratch_shapes=[pltpu.VMEM((tm, tn), jnp.float32)],
        ),
        compiler_params=pltpu.CompilerParams(
            # M/N parallel -> both TensorCores on v7x; K reduction is arbitrary.
            dimension_semantics=("parallel", "parallel", "arbitrary"),
            # <= 48 MiB keeps v7x (64 MiB physical VMEM) safe; tiles here use far less.
            vmem_limit_bytes=48 * 1024 * 1024,
        ),
        cost_estimate=cost,
    )(xp, wp, bp)

    return out[:B, :H]


def synthetic_lightning_forward(x, batch_idx, prepared):
    """Stand-in for LightningModule.forward(x, batch_idx) -> tuple."""
    # TODO(synk): the real wrapped LightningModule is arbitrary/unspecified in
    # FakeModule; this synthetic linear module defines its compute.
    del batch_idx  # unused by the synthetic module (mirrors passing 0)
    y = pallas_linear(x, prepared)
    aux = jnp.sum(y)  # second tuple element; dead under FakeModule + jit (DCE'd)
    return (y, aux)


def fake_module_forward(x, prepared):
    """FakeModule.forward: return self.module.forward(x, 0)[0]."""
    return synthetic_lightning_forward(x, 0, prepared)[0]


def _reference_linear(x, w, b, *, use_bf16_inputs=True):
    in_dtype = jnp.bfloat16 if use_bf16_inputs else x.dtype
    y = jnp.dot(
        x.astype(in_dtype), w.astype(in_dtype), preferred_element_type=jnp.float32
    ) + b.astype(jnp.float32)
    return y.astype(x.dtype)


def _run_case(key, B, F, H, *, atol=5e-3, rtol=5e-3):
    kx, kw, kb = jax.random.split(key, 3)
    x = jax.random.normal(kx, (B, F), dtype=jnp.float32)
    w = jax.random.normal(kw, (F, H), dtype=jnp.float32) * 0.02
    b = jax.random.normal(kb, (1, H), dtype=jnp.float32) * 0.01

    prepared = prepare_linear_params(w, b)          # one-time weight prep
    fwd = jax.jit(lambda xx: fake_module_forward(xx, prepared))

    out = fwd(x)
    jax.block_until_ready(out)
    ref = _reference_linear(x, w, b)
    assert out.shape == (B, H), (out.shape, (B, H))
    assert jnp.allclose(out, ref, atol=atol, rtol=rtol), (B, F, H)
    return out


if __name__ == "__main__":
    k0, k1, k2 = jax.random.split(jax.random.PRNGKey(0), 3)

    # 1) Small shape: typical FakeModule FLOPs-count probe (single grid step).
    _run_case(k0, 8, 128, 128)

    # 2) Moderate shape: K folds into a single step (tk=1536), M padded to two
    #    full 256-wide tiles -> grid (2, 1, 1) instead of the old (3, 3, 3).
    _run_case(k1, 384, 1536, 384)

    # 3) Ragged shape exercising the padding / un-padding path.
    _run_case(k2, 5, 70, 33)

    print("KERNEL_OK")
</pallas_src>

<mosaic_0001>
module attributes {stable_mosaic.version = 11 : i64} {
  func.func @_linear_kernel(%arg0: i32, %arg1: i32, %arg2: i32, %arg3: memref<16x128xbf16, #tpu.memory_space<vmem>>, %arg4: memref<128x128xbf16, #tpu.memory_space<vmem>>, %arg5: memref<1x128xf32, #tpu.memory_space<vmem>>, %arg6: memref<16x128xf32, #tpu.memory_space<vmem>>, %arg7: memref<16x128xf32, #tpu.memory_space<vmem>>) attributes {dimension_semantics = [#tpu.dimension_semantics<parallel>, #tpu.dimension_semantics<parallel>, #tpu.dimension_semantics<arbitrary>], iteration_bounds = array<i64: 1, 1, 1>, scalar_prefetch = 0 : i64, scratch_operands = 1 : i64, tpu.core_type = #tpu.core_type<tc>, window_params = [{transform_indices = @transform_0, window_bounds = array<i64: 16, 128>}, {transform_indices = @transform_1, window_bounds = array<i64: 128, 128>}, {transform_indices = @transform_2, window_bounds = array<i64: 1, 128>}, {transform_indices = @transform_3, window_bounds = array<i64: 16, 128>}]} {
    %c0_i32 = arith.constant 0 : i32
    %0 = arith.cmpi eq, %arg2, %c0_i32 : i32
    %1 = arith.extui %0 : i1 to i32
    %c0_i32_0 = arith.constant 0 : i32
    %2 = arith.cmpi ne, %1, %c0_i32_0 : i32
    scf.if %2 {
      %cst_10 = arith.constant 0.000000e+00 : f32
      %12 = vector.broadcast %cst_10 : f32 to vector<16x128xf32>
      %c0_11 = arith.constant 0 : index
      %c0_12 = arith.constant 0 : index
      %13 = vector.load %arg7[%c0_11, %c0_12] : memref<16x128xf32, #tpu.memory_space<vmem>>, vector<16x128xf32>
      tpu.vector_store %arg7[%c0_11, %c0_12], %12 {strides = array<i32>} : memref<16x128xf32, #tpu.memory_space<vmem>>, vector<16x128xf32>,
    } else {
    }
    %c0 = arith.constant 0 : index
    %c0_1 = arith.constant 0 : index
    %3 = vector.load %arg7[%c0, %c0_1] : memref<16x128xf32, #tpu.memory_space<vmem>>, vector<16x128xf32>
    %c0_2 = arith.constant 0 : index
    %c0_3 = arith.constant 0 : index
    %4 = vector.load %arg3[%c0_2, %c0_3] : memref<16x128xbf16, #tpu.memory_space<vmem>>, vector<16x128xbf16>
    %c0_4 = arith.constant 0 : index
    %c0_5 = arith.constant 0 : index
    %5 = vector.load %arg4[%c0_4, %c0_5] : memref<128x128xbf16, #tpu.memory_space<vmem>>, vector<128x128xbf16>
    %cst = arith.constant dense<0.000000e+00> : vector<16x128xf32>
    %6 = tpu.matmul %4, %5, %cst {dimension_numbers = #tpu.dot_dimension_numbers<[1], [0], [0], [1], [0, 0, 1, 1], [], []>} : vector<16x128xbf16>, vector<128x128xbf16>, vector<16x128xf32> -> vector<16x128xf32>
    %7 = arith.addf %3, %6 : vector<16x128xf32>
    %c0_6 = arith.constant 0 : index
    %c0_7 = arith.constant 0 : index
    %8 = vector.load %arg7[%c0_6, %c0_7] : memref<16x128xf32, #tpu.memory_space<vmem>>, vector<16x128xf32>
    tpu.vector_store %arg7[%c0_6, %c0_7], %7 {strides = array<i32>} : memref<16x128xf32, #tpu.memory_space<vmem>>, vector<16x128xf32>,
    %c0_i32_8 = arith.constant 0 : i32
    %9 = arith.cmpi eq, %arg2, %c0_i32_8 : i32
    %10 = arith.extui %9 : i1 to i32
    %c0_i32_9 = arith.constant 0 : i32
    %11 = arith.cmpi ne, %10, %c0_i32_9 : i32
    scf.if %11 {
      %c0_10 = arith.constant 0 : index
      %c0_11 = arith.constant 0 : index
      %12 = vector.load %arg7[%c0_10, %c0_11] : memref<16x128xf32, #tpu.memory_space<vmem>>, vector<16x128xf32>
      %c0_12 = arith.constant 0 : index
      %c0_13 = arith.constant 0 : index
      %13 = vector.load %arg5[%c0_12, %c0_13] : memref<1x128xf32, #tpu.memory_space<vmem>>, vector<1x128xf32>
      %14 = vector.broadcast %13 : vector<1x128xf32> to vector<16x128xf32>
      %15 = arith.addf %12, %14 : vector<16x128xf32>
      %c0_14 = arith.constant 0 : index
      %c0_15 = arith.constant 0 : index
      %16 = vector.load %arg6[%c0_14, %c0_15] : memref<16x128xf32, #tpu.memory_space<vmem>>, vector<16x128xf32>
      tpu.vector_store %arg6[%c0_14, %c0_15], %15 {strides = array<i32>} : memref<16x128xf32, #tpu.memory_space<vmem>>, vector<16x128xf32>,
    } else {
    }
    return
  }
  func.func @transform_0(%arg0: i32, %arg1: i32, %arg2: i32) -> (i32, i32) {
    %c0_i32 = arith.constant 0 : i32
    return %arg0, %arg2 : i32, i32
  }
  func.func @transform_1(%arg0: i32, %arg1: i32, %arg2: i32) -> (i32, i32) {
    %c0_i32 = arith.constant 0 : i32
    return %arg2, %arg1 : i32, i32
  }
  func.func @transform_2(%arg0: i32, %arg1: i32, %arg2: i32) -> (i32, i32) {
    %c0_i32 = arith.constant 0 : i32
    %c0_i32_0 = arith.constant 0 : i32
    return %c0_i32, %arg1 : i32, i32
  }
  func.func @transform_3(%arg0: i32, %arg1: i32, %arg2: i32) -> (i32, i32) {
    %c0_i32 = arith.constant 0 : i32
    return %arg0, %arg1 : i32, i32
  }
}

</mosaic_0001>

<bundles_post_ra>
// kernel: _lambda_.1
= control target key start
LH: loop header
LB: loop body
LE: loop exit
PB: predicated region body
PF: predicated region fallthrough
CT: control target
= control target key end

     0   :  { %8 = vsyncpa [#allocation4], 0  ;;  %s221_s15 = smov [#allocation3]   ;;  %s222_s17 = smov 64   ;;  %s259_s0 = inlined_call_operand.vmem [shape: bf16[16,128], index: 0, kind: input, shape index: {}]   ;;  %s260_s1 = inlined_call_operand.hbm [shape: bf16[128,128], index: 1, kind: input, shape index: {}]   ;;  %s261_s2 = inlined_call_operand.vmem [shape: f32[1,128], index: 2, kind: input, shape index: {}]   ;;  %s262_s3 = inlined_call_operand.vmem [shape: f32[16,128], index: 3, kind: output, shape index: {}]  }
   0x1   :  { %s15_s14 = sshll.u32 %s260_s1, 4  ;;  %s17_s16 = sshll.u32 %s221_s15, 4  ;;  %s16_s14 = int_to_ptr.hbm [resolvable:$true] %s15_s14  ;;  %s18_s16 = int_to_ptr.vmem [resolvable:$true] %s17_s16 }
   0x2   :  { %s223_s18 = smov 4  }
   0x3   :  { %23 = dma.hbm_to_vmem [thread:$0]  %s16_s14, 1024, %s18_s16, [#allocation4], %s222_s17, %s222_s17, %s223_s18  }
   0x4   :  { %219 = dma.done.wait [#allocation4], 1024  }
   0x5   :  { %220 = vsyncadd [#allocation4], 4294966272  ;;  %v190_v0 = vld [vmem:[#allocation3 + $0x38] sm:$0xff]  ;;  %v189_v1 = vld [vmem:[#allocation3 + $0x30] sm:$0xff] }
   0x6   :  { %110 = vmatpush.bf16.msra.mxu0 %v190_v0  ;;  %v188_v2 = vld [vmem:[#allocation3 + $0x28] sm:$0xff]  ;;  %v187_v3 = vld [vmem:[#allocation3 + $0x20] sm:$0xff]  ;;  %v186_v4 = vld [vmem:[#allocation3 + $0x18] sm:$0xff] }
   0x7   :  { %v185_v5 = vld [vmem:[#allocation3 + $0x10] sm:$0xff]  ;;  %v184_v6 = vld [vmem:[#allocation3 + $0x8] sm:$0xff]  ;;  %v183_v7 = vld [vmem:[#allocation3] sm:$0xff] }
   0x8   :  { %v182_v8 = vld [vmem:[%s259_s0] sm:$0xff] }
   0x9   :  { %v194_v9 = vld [vmem:[%s261_s2] ss:$0 sm:$0xff] }
   0xa   :  { %111 = vmatpush.bf16.msra.mxu0 %v189_v1 }
   0xe   :  { %112 = vmatpush.bf16.msra.mxu0 %v188_v2 }
  0x12   :  { %113 = vmatpush.bf16.msra.mxu0 %v187_v3 }
  0x16   :  { %114 = vmatpush.bf16.msra.mxu0 %v186_v4 }
  0x1a   :  { %115 = vmatpush.bf16.msra.mxu0 %v185_v5 }
  0x1e   :  { %116 = vmatpush.bf16.msra.mxu0 %v184_v6 }
  0x22   :  { %117 = vmatpush.bf16.msra.mxu0 %v183_v7 }
  0x25   :  { %118 = vmatmul.bf16.vlgmr.msra.gmra.mxu0 %v182_v8 }
  0xa2   :  { %v119_v10 = vpop.f32.mrf.mxu0 }
  0xa3   :  { %v137_v11 = vadd.f32 %v194_v9, %v119_v10 }
  0xa5   :  { %139 = vst [vmem:[%s262_s3] sm:$0xff] %v137_v11 }
  0xaa   :  { %v121_v12 = vpop.f32.mrf.mxu0 }
  0xab   :  { %v138_v13 = vadd.f32 %v194_v9, %v121_v12 }
  0xad   :  { %140 = vst [vmem:[%s262_s3 + $0x8] sm:$0xff] %v138_v13 }
  0xae   :  { %145 = vsyncpa [#allocation4], 1 }

</bundles_post_ra>
